<compile_context>
chip_gen: v6e
topology: v6e:2x2x1
jax: 0.10.0
libtpu: 0.0.40
codegen_flags: <defaults>
</compile_context>

<pallas_src>
import numpy as np
import jax
import jax.numpy as jnp
from jax import lax
from jax.experimental import pallas as pl
from jax.experimental.pallas import tpu as pltpu


def _coordconv_matmul_kernel(p_ref, w_ref, o_ref):
    """grid = (n_row_tiles,); one step = tile_m output pixels (all images flattened).

    p_ref: (tile_m, K_tot)  im2col rows: [KH*KW*C_in image taps | ho | wo | 1]
    w_ref: (K_tot, C_pad)   fused weights: [tap weights ; Ay ; Ax ; D(+bias)]
    o_ref: (tile_m, C_pad)  lane-dense output tile (channel padding cropped later)
    """
    o_ref[...] = jnp.dot(p_ref[...], w_ref[...],
                         preferred_element_type=jnp.float32).astype(o_ref.dtype)


def _cdiv(a, b):
    return -(-a // b)


def _vmem_capacity_bytes(default=64 * 1024 * 1024):
    """Generation-aware VMEM capacity (64 MiB v7x, 128 MiB v5e/v6e); safe fallback."""
    try:
        info = pltpu.get_tpu_info()
        cap = getattr(info, "vmem_capacity_bytes", None)
        if cap:
            return int(cap)
    except Exception:
        pass
    return default


def _pick_vmem_limit():
    # ~0.75 * physical, capped: ~48 MiB on v7x (64 MiB VMEM), ~96 MiB on v5e/v6e.
    return int(min(_vmem_capacity_bytes() * 3 // 4, 100 * 1024 * 1024))


def _pick_row_tiling(m_total, k_tot, c_pad, in_itemsize, vmem_limit_bytes):
    """Choose (tile_m, n_tiles, m_pad): biggest 8-aligned row tile that fits a
    conservative VMEM budget, while guaranteeing >=4 parallel grid steps when the
    problem is big enough (so v7x's two TensorCores each get >=2 steps)."""
    budget = int(vmem_limit_bytes * 0.6)                 # headroom for metadata/sems
    per_row = 2 * k_tot * in_itemsize + 2 * c_pad * 4    # double-buffered in + out rows
    fixed = 2 * k_tot * c_pad * in_itemsize              # (double-buffered) weight block
    max_rows = max(8, ((budget - fixed) // per_row) // 8 * 8)

    if m_total >= 32:
        min_steps = 4
    elif m_total >= 16:
        min_steps = 2
    else:
        min_steps = 1

    n_tiles = max(min_steps, _cdiv(m_total, max_rows))
    tile_m = _cdiv(_cdiv(m_total, n_tiles), 8) * 8
    return tile_m, n_tiles, tile_m * n_tiles


def coord_conv(x_nchw, weight, bias, *, matmul_dtype=jnp.float32):
    """CoordConv forward: prepend (y, x) coordinate channels, then KxK VALID conv.

    x_nchw: (N, C_in, H, W) float32
    weight: (C_out, C_in + 2, KH, KW)  PyTorch OIHW; channel 0 = y, channel 1 = x
    bias:   (C_out,)
    returns (N, C_out, H-KH+1, W-KW+1) float32   (stride=1, padding=0, groups=1)
    """
    n, c_in, h, w = x_nchw.shape
    c_out, c_tot, kh_size, kw_size = weight.shape
    assert c_tot == c_in + 2, "CoordConv conv must take C_in + 2 input channels"
    assert h > 1 and w > 1, "coordinate scaling requires H > 1 and W > 1"
    h_out = h - kh_size + 1
    w_out = w - kw_size + 1
    assert h_out >= 1 and w_out >= 1
    c_pad = _cdiv(c_out, 128) * 128
    k_img = kh_size * kw_size * c_in
    k_tot = k_img + 3                        # + [ho, wo, 1] pseudo channels

    # ---- im2col patches in the wrapper (review item 1, wrapper option):
    #      row (n, ho, wo) -> [x[n, ho+kh, wo+kw, ci] for kh,kw,ci] ++ [ho, wo, 1]
    xf = jnp.transpose(x_nchw, (0, 2, 3, 1)).astype(jnp.float32)       # NHWC
    taps = [xf[:, kh:kh + h_out, kw:kw + w_out, :]
            for kh in range(kh_size) for kw in range(kw_size)]
    ho = jnp.broadcast_to(jnp.arange(h_out, dtype=jnp.float32)[:, None],
                          (h_out, w_out))
    wo = jnp.broadcast_to(jnp.arange(w_out, dtype=jnp.float32)[None, :],
                          (h_out, w_out))
    ones = jnp.ones((h_out, w_out), jnp.float32)
    coords3 = jnp.broadcast_to(jnp.stack([ho, wo, ones], axis=-1)[None],
                               (n, h_out, w_out, 3))
    patches = jnp.concatenate(taps + [coords3], axis=-1)               # (N,Ho,Wo,K)
    m_total = n * h_out * w_out
    patches = patches.reshape(m_total, k_tot).astype(matmul_dtype)

    # ---- fused weight matrix: image-tap rows + 3 affine rows for the coords.
    #      coord_out[ho, wo, :] = ho*Ay + wo*Ax + D,   bias folded into D.
    wf = weight.astype(jnp.float32)
    w_img = jnp.transpose(wf[:, 2:], (2, 3, 1, 0)).reshape(k_img, c_out)
    wy = wf[:, 0]                                     # (C_out, KH, KW) y-channel
    wx = wf[:, 1]                                     # (C_out, KH, KW) x-channel
    kh_idx = jnp.arange(kh_size, dtype=jnp.float32)[None, :, None]
    kw_idx = jnp.arange(kw_size, dtype=jnp.float32)[None, None, :]
    ay = (2.0 / (h - 1.0)) * jnp.sum(wy, axis=(1, 2))
    ax = (2.0 / (w - 1.0)) * jnp.sum(wx, axis=(1, 2))
    d = (bias.astype(jnp.float32)
         + jnp.sum((2.0 * kh_idx / (h - 1.0) - 1.0) * wy, axis=(1, 2))
         + jnp.sum((2.0 * kw_idx / (w - 1.0) - 1.0) * wx, axis=(1, 2)))
    w_mat = jnp.concatenate([w_img, ay[None], ax[None], d[None]], axis=0)
    w_mat = jnp.pad(w_mat, ((0, 0), (0, c_pad - c_out))).astype(matmul_dtype)

    # ---- generation-aware tiling / VMEM limit.
    in_itemsize = jnp.dtype(matmul_dtype).itemsize
    vmem_limit = _pick_vmem_limit()
    tile_m, n_tiles, m_pad = _pick_row_tiling(m_total, k_tot, c_pad,
                                              in_itemsize, vmem_limit)
    patches = jnp.pad(patches, ((0, m_pad - m_total), (0, 0)))

    cost = pl.CostEstimate(
        flops=2 * m_pad * k_tot * c_pad,
        transcendentals=0,
        bytes_accessed=(m_pad * k_tot * in_itemsize
                        + k_tot * c_pad * in_itemsize
                        + m_pad * c_pad * 4))

    out_flat = pl.pallas_call(
        _coordconv_matmul_kernel,
        out_shape=jax.ShapeDtypeStruct((m_pad, c_pad), jnp.float32),
        grid=(n_tiles,),
        in_specs=[
            pl.BlockSpec((tile_m, k_tot), lambda i: (i, 0)),
            pl.BlockSpec((k_tot, c_pad), lambda i: (0, 0)),
        ],
        out_specs=pl.BlockSpec((tile_m, c_pad), lambda i: (i, 0)),
        compiler_params=pltpu.CompilerParams(
            dimension_semantics=("parallel",),
            vmem_limit_bytes=vmem_limit),
        cost_estimate=cost,
    )(patches, w_mat)

    # Crop the row padding + channel padding, restore NCHW.
    out = out_flat[:m_total, :c_out].reshape(n, h_out, w_out, c_out)
    return jnp.transpose(out, (0, 3, 1, 2))


if __name__ == "__main__":
    key = jax.random.PRNGKey(0)
    k1, k2, k3 = jax.random.split(key, 3)

    N, C_in, H, W = 2, 4, 16, 16
    C_out, K = 8, 3

    x = jax.random.normal(k1, (N, C_in, H, W), dtype=jnp.float32)

    # Deterministic init mimicking nn.Conv2d default: U(-b, b), b = 1/sqrt(fan_in)
    fan_in = (C_in + 2) * K * K
    bound = 1.0 / float(np.sqrt(fan_in))
    weight = jax.random.uniform(k2, (C_out, C_in + 2, K, K),
                                jnp.float32, -bound, bound)
    bias = jax.random.uniform(k3, (C_out,), jnp.float32, -bound, bound)

    coord_conv_jit = jax.jit(coord_conv)
    out = coord_conv_jit(x, weight, bias)
    out = jax.block_until_ready(out)

    # Plain-JAX reference of the exact PyTorch semantics (sanity check).
    ys = 2.0 * jnp.arange(H, dtype=jnp.float32)[:, None] / (H - 1.0) - 1.0
    xs = 2.0 * jnp.arange(W, dtype=jnp.float32)[None, :] / (W - 1.0) - 1.0
    coords = jnp.stack([jnp.broadcast_to(ys, (H, W)),
                        jnp.broadcast_to(xs, (H, W))], axis=0)
    coords = jnp.broadcast_to(coords[None], (N, 2, H, W))
    xc = jnp.concatenate([coords, x], axis=1)
    ref = lax.conv_general_dilated(
        xc, weight, window_strides=(1, 1), padding='VALID',
        dimension_numbers=('NCHW', 'OIHW', 'NCHW'))
    ref = ref + bias[None, :, None, None]

    assert out.shape == (N, C_out, H - K + 1, W - K + 1)
    np.testing.assert_allclose(np.asarray(out), np.asarray(ref),
                               atol=1e-4, rtol=1e-4)
    print("KERNEL_OK")
</pallas_src>

<mosaic_0001>
module attributes {stable_mosaic.version = 11 : i64} {
  func.func @_coordconv_matmul_kernel(%arg0: i32, %arg1: memref<104x39xf32, #tpu.memory_space<vmem>>, %arg2: memref<39x128xf32, #tpu.memory_space<vmem>>, %arg3: memref<104x128xf32, #tpu.memory_space<vmem>>) attributes {dimension_semantics = [#tpu.dimension_semantics<parallel>], iteration_bounds = array<i64: 4>, scalar_prefetch = 0 : i64, scratch_operands = 0 : i64, tpu.core_type = #tpu.core_type<tc>, window_params = [{transform_indices = @transform_0, window_bounds = array<i64: 104, 39>}, {pipeline_mode = #tpu.pipeline_mode<synchronous>, transform_indices = @transform_1, window_bounds = array<i64: 39, 128>}, {transform_indices = @transform_2, window_bounds = array<i64: 104, 128>}]} {
    %c0 = arith.constant 0 : index
    %c0_0 = arith.constant 0 : index
    %0 = vector.load %arg1[%c0, %c0_0] : memref<104x39xf32, #tpu.memory_space<vmem>>, vector<104x39xf32>
    %c0_1 = arith.constant 0 : index
    %c0_2 = arith.constant 0 : index
    %1 = vector.load %arg2[%c0_1, %c0_2] : memref<39x128xf32, #tpu.memory_space<vmem>>, vector<39x128xf32>
    %cst = arith.constant dense<0.000000e+00> : vector<104x128xf32>
    %2 = tpu.matmul %0, %1, %cst {dimension_numbers = #tpu.dot_dimension_numbers<[1], [0], [0], [1], [0, 0, 1, 1], [], []>} : vector<104x39xf32>, vector<39x128xf32>, vector<104x128xf32> -> vector<104x128xf32>
    %c0_3 = arith.constant 0 : index
    %c0_4 = arith.constant 0 : index
    %3 = vector.load %arg3[%c0_3, %c0_4] : memref<104x128xf32, #tpu.memory_space<vmem>>, vector<104x128xf32>
    tpu.vector_store %arg3[%c0_3, %c0_4], %2 {strides = array<i32>} : memref<104x128xf32, #tpu.memory_space<vmem>>, vector<104x128xf32>,
    return
  }
  func.func @transform_0(%arg0: i32) -> (i32, i32) {
    %c0_i32 = arith.constant 0 : i32
    %c0_i32_0 = arith.constant 0 : i32
    return %arg0, %c0_i32 : i32, i32
  }
  func.func @transform_1(%arg0: i32) -> (i32, i32) {
    %c0_i32 = arith.constant 0 : i32
    %c0_i32_0 = arith.constant 0 : i32
    %c0_i32_1 = arith.constant 0 : i32
    return %c0_i32, %c0_i32_0 : i32, i32
  }
  func.func @transform_2(%arg0: i32) -> (i32, i32) {
    %c0_i32 = arith.constant 0 : i32
    %c0_i32_0 = arith.constant 0 : i32
    return %arg0, %c0_i32 : i32, i32
  }
}

</mosaic_0001>

<bundles_post_ra>
// kernel: coord_conv.1
= control target key start
LH: loop header
LB: loop body
LE: loop exit
PB: predicated region body
PF: predicated region fallthrough
CT: control target
= control target key end

     0   :  { %s543_s9 = smov 0   ;;  %s661_s0 = inlined_call_operand.vmem [shape: f32[416,39], index: 0, kind: input, shape index: {}]   ;;  %s662_s1 = inlined_call_operand.vmem [shape: f32[39,128], index: 1, kind: input, shape index: {}]   ;;  %s663_s2 = inlined_call_operand.vmem [shape: f32[416,128], index: 2, kind: output, shape index: {}]  }
   0x1 LB: > { %s408_s10 = sadd.s32 4294967295, %s524_s9   ;;  %p412_p0 = scmp.ge.s32.totalorder %s524_s9, 1  ;;  %s524_s9 = sphi %s543_s9, %s12_s9  }
   0x2   : > { %p113_p1 = scmp.lt.s32.totalorder %s524_s9, 5 }
   0x4   : > { %p114_p2 = pnand %p412_p0, %p113_p1 }
   0x5   : > { %s135_s15 = smul.u32 (!%p114_p2), 13, %s408_s10 }
   0x6   : > { %117 = sbr.rel (%p114_p2) target bundleno = 241 (0xf1), region = 28 }
   0x7   : > { %p136_p3 = scmp.lt.s32.totalorder (!%p114_p2), %s135_s15, 51 }
   0xb   : > { %v164_v0 = vld [vmem:[%s662_s1 + $0x20] sm:$0x7f]  ;;  %vm205_vm0 = vcmask 1046528   ;;  %v526_v1 = vmov 0.0   ;;  %v163_v2 = vld [vmem:[%s662_s1 + $0x18] sm:$0xff]  ;;  %v162_v3 = vld [vmem:[%s662_s1 + $0x10] sm:$0xff] }
   0xc   : > { %449 = vmatprep.subr.mxu0 %v526_v1  ;;  %498 = vmatprep.subr.mxu1 %v526_v1  ;;  %v161_v4 = vld [vmem:[%s662_s1 + $0x8] sm:$0xff]  ;;  %s665_s15 = smov (!%p136_p3, %s135_s15), 51  ;;  %v160_v5 = vld [vmem:[%s662_s1] sm:$0xff]  ;;  %vm165_vm1 = vcmask 318464   ;;  %vm527_vm2 = vmmov 0  }
   0xd   : > { %450 = vmatpush3.msk.msra.mxu0 %vm205_vm0, %v164_v0  ;;  %503 = vmatpush3.msk.msra.mxu1 %vm205_vm0, %v164_v0  ;;  %s413_s22 = sshll.u32 %s665_s15, 3 }
   0xe   : > { %451 = vmatprep.subr.mxu0 %v526_v1  ;;  %499 = vmatprep.subr.mxu1 %v526_v1  ;;  %s582_s25 = scalar_lea.vmem %s661_s0, %s413_s22  ;;  %s643_s28 = scalar_lea.vmem %s663_s2, %s413_s22 }
   0xf   : > { %452 = vmatpush3.msra.mxu0 %v163_v2  ;;  %504 = vmatpush3.msra.mxu1 %v163_v2  ;;  %v147_v6 = vld [vmem:[%s582_s25] sm:$0xff]  ;;  %v154_v7 = vld [vmem:[%s582_s25 + $0x38] sm:$0xff]  ;;  %v148_v8 = vld [vmem:[%s582_s25 + $0x8] sm:$0xff] }
  0x10   : > { %453 = vmatprep.subr.mxu0 %v526_v1  ;;  %500 = vmatprep.subr.mxu1 %v526_v1  ;;  %v155_v9 = vld [vmem:[%s582_s25 + $0x40] sm:$0xff]  ;;  %v149_v10 = vld [vmem:[%s582_s25 + $0x10] sm:$0xff]  ;;  %v156_v11 = vld [vmem:[%s582_s25 + $0x48] sm:$0xff] }
  0x11   : > { %454 = vmatpush3.msra.mxu0 %v162_v3  ;;  %505 = vmatpush3.msra.mxu1 %v162_v3  ;;  %v150_v12 = vld [vmem:[%s582_s25 + $0x18] sm:$0xff]  ;;  %v157_v13 = vld [vmem:[%s582_s25 + $0x50] sm:$0xff]  ;;  %v151_v14 = vld [vmem:[%s582_s25 + $0x20] sm:$0xff] }
  0x12   : > { %455 = vmatprep.subr.mxu0 %v526_v1  ;;  %501 = vmatprep.subr.mxu1 %v526_v1  ;;  %v158_v15 = vld [vmem:[%s582_s25 + $0x58] sm:$0xff]  ;;  %v152_v16 = vld [vmem:[%s582_s25 + $0x28] sm:$0xff]  ;;  %v159_v17 = vld [vmem:[%s582_s25 + $0x60] sm:$0xff] }
  0x13   : > { %456 = vmatpush3.msra.mxu0 %v161_v4  ;;  %506 = vmatpush3.msra.mxu1 %v161_v4  ;;  %v153_v18 = vld [vmem:[%s582_s25 + $0x30] sm:$0xff] }
  0x14   : > { %457 = vmatprep.subr.mxu0 %v526_v1  ;;  %459 = vmatprep.mubr.msk.f32.mxu0 %vm527_vm2, %v526_v1 }
  0x15   : > { %458 = vmatpush3.msra.mxu0 %v160_v5  ;;  %502 = vmatprep.subr.mxu1 %v526_v1 }
  0x16   : > { %460 = vmatmul.mubr.msk.f32.vlgmr.msra.gmra.mxu0 %vm165_vm1, %v147_v6  ;;  %507 = vmatpush3.msra.mxu1 %v160_v5 }
  0x17   : > { %480 = vmatprep.mubr.msk.f32.mxu1 %vm527_vm2, %v526_v1  ;;  %462 = vmatprep.mubr.msk.f32.mxu0 %vm527_vm2, %v526_v1 }
  0x18   : > { %481 = vmatmul.mubr.msk.f32.vlgmr.msra.gmra.mxu1 %vm165_vm1, %v154_v7 }
  0x19   : > { %483 = vmatprep.mubr.msk.f32.mxu1 %vm527_vm2, %v526_v1 }
  0x1a   : > { %463 = vmatmul.mubr.msk.f32.gmra.mxu0 %vm165_vm1, %v148_v8 }
  0x1b   : > { %465 = vmatprep.mubr.msk.f32.mxu0 %vm527_vm2, %v526_v1 }
  0x1c   : > { %484 = vmatmul.mubr.msk.f32.gmra.mxu1 %vm165_vm1, %v155_v9 }
  0x1d   : > { %486 = vmatprep.mubr.msk.f32.mxu1 %vm527_vm2, %v526_v1 }
  0x1e   : > { %466 = vmatmul.mubr.msk.f32.gmra.mxu0 %vm165_vm1, %v149_v10 }
  0x1f   : > { %468 = vmatprep.mubr.msk.f32.mxu0 %vm527_vm2, %v526_v1 }
  0x20   : > { %487 = vmatmul.mubr.msk.f32.gmra.mxu1 %vm165_vm1, %v156_v11 }
  0x21   : > { %489 = vmatprep.mubr.msk.f32.mxu1 %vm527_vm2, %v526_v1 }
  0x22   : > { %469 = vmatmul.mubr.msk.f32.gmra.mxu0 %vm165_vm1, %v150_v12 }
  0x23   : > { %471 = vmatprep.mubr.msk.f32.mxu0 %vm527_vm2, %v526_v1 }
  0x24   : > { %490 = vmatmul.mubr.msk.f32.gmra.mxu1 %vm165_vm1, %v157_v13 }
  0x25   : > { %492 = vmatprep.mubr.msk.f32.mxu1 %vm527_vm2, %v526_v1 }
  0x26   : > { %472 = vmatmul.mubr.msk.f32.gmra.mxu0 %vm165_vm1, %v151_v14 }
  0x27   : > { %474 = vmatprep.mubr.msk.f32.mxu0 %vm527_vm2, %v526_v1 }
  0x28   : > { %493 = vmatmul.mubr.msk.f32.gmra.mxu1 %vm165_vm1, %v158_v15 }
  0x29   : > { %495 = vmatprep.mubr.msk.f32.mxu1 %vm527_vm2, %v526_v1 }
  0x2a   : > { %475 = vmatmul.mubr.msk.f32.gmra.mxu0 %vm165_vm1, %v152_v16 }
  0x2b   : > { %477 = vmatprep.mubr.msk.f32.mxu0 %vm527_vm2, %v526_v1 }
  0x2c   : > { %496 = vmatmul.mubr.msk.f32.gmra.mxu1 %vm165_vm1, %v159_v17 }
  0x2e   : > { %478 = vmatmul.mubr.msk.f32.gmra.mxu0 %vm165_vm1, %v153_v18 }
  0xd6   : > { %v275_v19 = vpop.f32.mrf.mxu0 }
  0xd7   : > { %339 = vst [vmem:[%s643_s28] sm:$0xff] %v275_v19 }
  0xd8   : > { %v461_v20 = vpop.f32.mrf.mxu0  ;;  %v310_v21 = vpop.f32.mrf.mxu1 }
  0xd9   : > { %346 = vst [vmem:[%s643_s28 + $0x38] sm:$0xff] %v310_v21 }
  0xda   : > { %v280_v22 = vpop.f32.mrf.mxu0  ;;  %v482_v23 = vpop.f32.mrf.mxu1 }
  0xdb   : > { %340 = vst [vmem:[%s643_s28 + $0x8] sm:$0xff] %v280_v22 }
  0xdc   : > { %v464_v24 = vpop.f32.mrf.mxu0  ;;  %v315_v25 = vpop.f32.mrf.mxu1 }
  0xdd   : > { %347 = vst [vmem:[%s643_s28 + $0x40] sm:$0xff] %v315_v25 }
  0xde   : > { %v285_v26 = vpop.f32.mrf.mxu0  ;;  %v485_v27 = vpop.f32.mrf.mxu1 }
  0xdf   : > { %341 = vst [vmem:[%s643_s28 + $0x10] sm:$0xff] %v285_v26 }
  0xe0   : > { %v467_v28 = vpop.f32.mrf.mxu0  ;;  %v320_v29 = vpop.f32.mrf.mxu1 }
  0xe1   : > { %348 = vst [vmem:[%s643_s28 + $0x48] sm:$0xff] %v320_v29 }
  0xe2   : > { %v290_v30 = vpop.f32.mrf.mxu0  ;;  %v488_v31 = vpop.f32.mrf.mxu1 }
  0xe3   : > { %342 = vst [vmem:[%s643_s28 + $0x18] sm:$0xff] %v290_v30 }
  0xe4   : > { %v470_v32 = vpop.f32.mrf.mxu0  ;;  %v325_v33 = vpop.f32.mrf.mxu1 }
  0xe5   : > { %349 = vst [vmem:[%s643_s28 + $0x50] sm:$0xff] %v325_v33 }
  0xe6   : > { %v295_v34 = vpop.f32.mrf.mxu0  ;;  %v491_v35 = vpop.f32.mrf.mxu1 }
  0xe7   : > { %343 = vst [vmem:[%s643_s28 + $0x20] sm:$0xff] %v295_v34 }
  0xe8   : > { %v473_v36 = vpop.f32.mrf.mxu0  ;;  %v330_v37 = vpop.f32.mrf.mxu1 }
  0xe9   : > { %350 = vst [vmem:[%s643_s28 + $0x58] sm:$0xff] %v330_v37 }
  0xea   : > { %v300_v38 = vpop.f32.mrf.mxu0  ;;  %v494_v39 = vpop.f32.mrf.mxu1 }
  0xeb   : > { %344 = vst [vmem:[%s643_s28 + $0x28] sm:$0xff] %v300_v38 }
  0xec   : > { %v476_v40 = vpop.f32.mrf.mxu0  ;;  %v335_v41 = vpop.f32.mrf.mxu1 }
  0xed   : > { %351 = vst [vmem:[%s643_s28 + $0x60] sm:$0xff] %v335_v41 }
  0xee   : > { %v305_v42 = vpop.f32.mrf.mxu0  ;;  %v497_v43 = vpop.f32.mrf.mxu1 }
  0xef   : > { %345 = vst [vmem:[%s643_s28 + $0x30] sm:$0xff] %v305_v42 }
  0xf0   : > { %v479_v44 = vpop.f32.mrf.mxu0 }
  0xf1 PF: > { %s12_s9 = sadd.s32 1, %s524_s9  }
  0xf2   : > { %p9_p4 = scmp.ge.s32.totalorder %s12_s9, 6  }
  0xf4   :  { %11 = sbr.rel (!%p9_p4) target bundleno = 1 (0x1), region = 58 }

</bundles_post_ra>
